<compile_context>
chip_gen: v7x
topology: tpu7x:2x2x1
jax: 0.10.0
libtpu: 0.0.40
codegen_flags: <defaults>
</compile_context>

<pallas_src>
import functools
import math

import jax
import jax.numpy as jnp
from jax.experimental import pallas as pl
from jax.experimental.pallas import tpu as pltpu


def _label_smoothing_kernel(x_ref, tgt_ref, out_ref, acc_ref, *,
                            confidence, smooth_val, padding_token,
                            n_rows, row_tile, tlogt_row):
    i = pl.program_id(0)

    @pl.when(i == 0)
    def _():
        acc_ref[0, 0] = jnp.float32(0.0)

    x = x_ref[...].astype(jnp.float32)        # (TN, V)
    tgt = tgt_ref[...]                        # (TN, 1) int32
    vocab = x.shape[1]

    # Single transcendental pass over the tile; xm is reused for everything.
    m = jnp.max(x, axis=-1, keepdims=True)                           # (TN, 1)
    xm = x - m                                                       # (TN, V)
    lse = jnp.log(jnp.sum(jnp.exp(xm), axis=-1, keepdims=True))      # (TN, 1)
    sum_xm = jnp.sum(xm, axis=-1, keepdims=True)                     # (TN, 1)

    # xm at the target column (masked gather; the only other full-tile op).
    cols = jax.lax.broadcasted_iota(jnp.int32, xm.shape, 1)
    xm_tgt = jnp.sum(jnp.where(cols == tgt, xm, 0.0), axis=-1, keepdims=True)

    logp_tgt = xm_tgt - lse                                          # (TN, 1)
    sum_logp = sum_xm - vocab * lse                                  # (TN, 1)

    # loss_row = sum_v t*log(t) - sum_v t*logp
    #          = tlogt_row - (conf - smooth)*logp[tgt] - smooth * sum_v logp
    row_loss = (tlogt_row
                - (confidence - smooth_val) * logp_tgt
                - smooth_val * sum_logp)

    # Mask padding-token rows and rows past the real end (partial last tile).
    row_ids = (i * row_tile
               + jax.lax.broadcasted_iota(jnp.int32, (row_tile, 1), 0))
    valid = jnp.logical_and(row_ids < n_rows, tgt != padding_token)
    tile_sum = jnp.sum(jnp.where(valid, row_loss, 0.0))

    acc_ref[0, 0] += tile_sum

    @pl.when(i == pl.num_programs(0) - 1)
    def _():
        out_ref[0, 0] = acc_ref[0, 0]


def _xlogx(v):
    return 0.0 if v <= 0.0 else float(v) * math.log(float(v))


def _vmem_capacity_bytes():
    try:
        info = pltpu.get_tpu_info()
        return int(getattr(info, "vmem_capacity_bytes", 64 * 1024 * 1024))
    except Exception:
        return 64 * 1024 * 1024


def label_smoothing_loss(x, targets, *, size, padding_token, smoothing=0.0,
                         row_tile=None):
    """Pallas implementation of LabelSmoothingLoss.forward.

    x: [batch, seq, vocab] float array, targets: [batch, seq] int array.
    Returns a float32 scalar loss.
    """
    assert x.shape[2] == size
    batch, seq, vocab = x.shape
    n_rows = batch * seq

    confidence = 1.0 - smoothing
    if size > 2:
        smooth_val = smoothing / (size - 2)
    else:
        # The module divides by (size - 2); only smoothing == 0 is well-defined.
        assert smoothing == 0.0, "size <= 2 requires smoothing == 0.0"
        smooth_val = 0.0
    # sum_v t*log(t) for a non-padding row: confidence at the target column,
    # smooth_val at the other (V-1) columns (the module does not zero the
    # padding column for non-padding rows; matches the PyTorch spec).
    tlogt_row = _xlogx(confidence) + (size - 1) * _xlogx(smooth_val)

    # Chip-generation-aware sizing: bigger tiles / higher scoped-VMEM limit on
    # 128-MiB-VMEM v5e/v6e, conservative values for 64-MiB-VMEM v7x.
    vmem_cap = _vmem_capacity_bytes()
    if vmem_cap >= 100 * 1024 * 1024:
        target_bytes = 8 * 1024 * 1024
        vmem_limit = 96 * 1024 * 1024
    else:
        target_bytes = 4 * 1024 * 1024
        vmem_limit = 48 * 1024 * 1024

    if row_tile is None:
        row_tile = target_bytes // (vocab * 4)
        row_tile = max(8, min(row_tile, 512))       # cap: narrow-temp pressure
        row_tile = (row_tile // 8) * 8
        needed = ((n_rows + 7) // 8) * 8
        row_tile = max(8, min(row_tile, needed))
    assert row_tile % 8 == 0

    x_flat = x.reshape(n_rows, vocab)
    tgt_flat = targets.reshape(n_rows, 1).astype(jnp.int32)

    t_total = pl.cdiv(n_rows, row_tile)

    kernel = functools.partial(
        _label_smoothing_kernel,
        confidence=confidence, smooth_val=smooth_val,
        padding_token=padding_token, n_rows=n_rows, row_tile=row_tile,
        tlogt_row=tlogt_row)

    itemsize = jnp.dtype(x.dtype).itemsize
    cost = pl.CostEstimate(
        flops=6 * n_rows * vocab,
        transcendentals=n_rows * vocab,
        bytes_accessed=n_rows * vocab * itemsize + n_rows * 4 + 4)

    total = pl.pallas_call(
        kernel,
        out_shape=jax.ShapeDtypeStruct((1, 1), jnp.float32),
        grid_spec=pltpu.PrefetchScalarGridSpec(
            num_scalar_prefetch=0,
            grid=(t_total,),
            in_specs=[
                pl.BlockSpec((row_tile, vocab), lambda i: (i, 0)),
                pl.BlockSpec((row_tile, 1), lambda i: (i, 0)),
            ],
            out_specs=pl.BlockSpec(memory_space=pltpu.MemorySpace.SMEM),
            scratch_shapes=[pltpu.SMEM((1, 1), jnp.float32)],
        ),
        compiler_params=pltpu.CompilerParams(
            dimension_semantics=("arbitrary",),
            vmem_limit_bytes=vmem_limit),
        cost_estimate=cost,
    )(x_flat, tgt_flat)

    # reduction='batchmean' divides by the flattened batch dim (batch*seq).
    return total[0, 0] / jnp.float32(n_rows)


def _reference(x, targets, *, size, padding_token, smoothing):
    """Pure-JAX reference mirroring the PyTorch module."""
    batch, seq, vocab = x.shape
    n = batch * seq
    confidence = 1.0 - smoothing
    smooth_val = smoothing / (size - 2)
    logp = jax.nn.log_softmax(x.astype(jnp.float32), axis=-1).reshape(n, vocab)
    tgt = targets.reshape(n)
    t = jnp.full((n, vocab), smooth_val, jnp.float32)
    t = t.at[jnp.arange(n), tgt].set(confidence)
    t = jnp.where((tgt == padding_token)[:, None], 0.0, t)
    tlogt = jnp.where(t > 0, t * jnp.log(jnp.where(t > 0, t, 1.0)), 0.0)
    return jnp.sum(tlogt - t * logp) / n


if __name__ == "__main__":
    key = jax.random.PRNGKey(0)
    k1, k2 = jax.random.split(key)

    padding_token = 0
    smoothing = 0.1

    # Case 1: shapes from the module spec (batch, seq, vocab).
    batch, seq, vocab = 2, 8, 32
    x = jax.random.normal(k1, (batch, seq, vocab), dtype=jnp.float32)
    targets = jax.random.randint(k2, (batch, seq), 0, vocab, dtype=jnp.int32)

    loss = label_smoothing_loss(
        x, targets, size=vocab, padding_token=padding_token,
        smoothing=smoothing)
    loss = jax.block_until_ready(loss)
    ref = _reference(x, targets, size=vocab, padding_token=padding_token,
                     smoothing=smoothing)
    assert jnp.allclose(loss, ref, rtol=1e-4, atol=1e-5), (loss, ref)

    # Case 2: multi-tile grid with a partial last tile and explicit padding
    # tokens.
    b2, s2, v2 = 3, 17, 257
    x2 = jax.random.normal(k1, (b2, s2, v2), dtype=jnp.float32)
    t2 = jax.random.randint(k2, (b2, s2), 0, v2, dtype=jnp.int32)
    t2 = t2.at[0, :3].set(padding_token)
    loss2 = label_smoothing_loss(
        x2, t2, size=v2, padding_token=padding_token, smoothing=smoothing,
        row_tile=8)
    loss2 = jax.block_until_ready(loss2)
    ref2 = _reference(x2, t2, size=v2, padding_token=padding_token,
                      smoothing=smoothing)
    assert jnp.allclose(loss2, ref2, rtol=1e-4, atol=1e-5), (loss2, ref2)

    print("KERNEL_OK")
</pallas_src>

<mosaic_0001>
module attributes {stable_mosaic.version = 11 : i64} {
  func.func @_label_smoothing_kernel(%arg0: i32, %arg1: memref<16x32xf32, #tpu.memory_space<vmem>>, %arg2: memref<16x1xi32, #tpu.memory_space<vmem>>, %arg3: memref<1x1xf32, #tpu.memory_space<smem>>, %arg4: memref<1x1xf32, #tpu.memory_space<smem>>) attributes {dimension_semantics = [#tpu.dimension_semantics<arbitrary>], iteration_bounds = array<i64: 1>, scalar_prefetch = 0 : i64, scratch_operands = 1 : i64, tpu.core_type = #tpu.core_type<tc>, window_params = [{transform_indices = @transform_0, window_bounds = array<i64: 16, 32>}, {transform_indices = @transform_1, window_bounds = array<i64: 16, 1>}, {transform_indices = @transform_2, window_bounds = array<i64: 1, 1>}]} {
    %c0_i32 = arith.constant 0 : i32
    %0 = arith.cmpi eq, %arg0, %c0_i32 : i32
    %1 = arith.extui %0 : i1 to i32
    %c0_i32_0 = arith.constant 0 : i32
    %2 = arith.cmpi ne, %1, %c0_i32_0 : i32
    scf.if %2 {
      %cst_22 = arith.constant 0.000000e+00 : f32
      %c0_23 = arith.constant 0 : index
      %c0_24 = arith.constant 0 : index
      %54 = memref.load %arg4[%c0_23, %c0_24] : memref<1x1xf32, #tpu.memory_space<smem>>
      memref.store %cst_22, %arg4[%c0_23, %c0_24] : memref<1x1xf32, #tpu.memory_space<smem>>
    } else {
    }
    %c0 = arith.constant 0 : index
    %c0_1 = arith.constant 0 : index
    %3 = vector.load %arg1[%c0, %c0_1] : memref<16x32xf32, #tpu.memory_space<vmem>>, vector<16x32xf32>
    %c0_2 = arith.constant 0 : index
    %c0_3 = arith.constant 0 : index
    %4 = vector.load %arg2[%c0_2, %c0_3] : memref<16x1xi32, #tpu.memory_space<vmem>>, vector<16x1xi32>
    %cst = arith.constant dense<0xFF800000> : vector<16xf32>
    %5 = vector.multi_reduction <maximumf>, %3, %cst [1] : vector<16x32xf32> to vector<16xf32>
    %6 = vector.shape_cast %5 : vector<16xf32> to vector<16x1xf32>
    %7 = vector.broadcast %6 : vector<16x1xf32> to vector<16x32xf32>
    %8 = arith.subf %3, %7 : vector<16x32xf32>
    %9 = math.exp %8 : vector<16x32xf32>
    %cst_4 = arith.constant dense<0.000000e+00> : vector<16xf32>
    %10 = vector.multi_reduction <add>, %9, %cst_4 [1] : vector<16x32xf32> to vector<16xf32>
    %11 = vector.shape_cast %10 : vector<16xf32> to vector<16x1xf32>
    %12 = math.log %11 : vector<16x1xf32>
    %cst_5 = arith.constant dense<0.000000e+00> : vector<16xf32>
    %13 = vector.multi_reduction <add>, %8, %cst_5 [1] : vector<16x32xf32> to vector<16xf32>
    %14 = vector.shape_cast %13 : vector<16xf32> to vector<16x1xf32>
    %15 = tpu.iota {dimensions = array<i32: 1>} : vector<16x32xi32>
    %16 = vector.broadcast %4 : vector<16x1xi32> to vector<16x32xi32>
    %17 = arith.cmpi eq, %15, %16 : vector<16x32xi32>
    %cst_6 = arith.constant 0.000000e+00 : f32
    %18 = vector.broadcast %cst_6 : f32 to vector<16x32xf32>
    %19 = arith.select %17, %8, %18 : vector<16x32xi1>, vector<16x32xf32>
    %cst_7 = arith.constant dense<0.000000e+00> : vector<16xf32>
    %20 = vector.multi_reduction <add>, %19, %cst_7 [1] : vector<16x32xf32> to vector<16xf32>
    %21 = vector.shape_cast %20 : vector<16xf32> to vector<16x1xf32>
    %22 = arith.subf %21, %12 : vector<16x1xf32>
    %cst_8 = arith.constant 3.200000e+01 : f32
    %23 = vector.broadcast %cst_8 : f32 to vector<16x1xf32>
    %24 = arith.mulf %23, %12 : vector<16x1xf32>
    %25 = arith.subf %14, %24 : vector<16x1xf32>
    %cst_9 = arith.constant 0.896666646 : f32
    %26 = vector.broadcast %cst_9 : f32 to vector<16x1xf32>
    %27 = arith.mulf %26, %22 : vector<16x1xf32>
    %cst_10 = arith.constant -0.684215307 : f32
    %28 = vector.broadcast %cst_10 : f32 to vector<16x1xf32>
    %29 = arith.subf %28, %27 : vector<16x1xf32>
    %cst_11 = arith.constant 0.00333333341 : f32
    %30 = vector.broadcast %cst_11 : f32 to vector<16x1xf32>
    %31 = arith.mulf %30, %25 : vector<16x1xf32>
    %32 = arith.subf %29, %31 : vector<16x1xf32>
    %c16_i32 = arith.constant 16 : i32
    %33 = arith.muli %arg0, %c16_i32 : i32
    %34 = tpu.iota {dimensions = array<i32: 0>} : vector<16x1xi32>
    %35 = vector.broadcast %33 : i32 to vector<16x1xi32>
    %36 = arith.addi %35, %34 : vector<16x1xi32>
    %c16_i32_12 = arith.constant 16 : i32
    %37 = vector.broadcast %c16_i32_12 : i32 to vector<16x1xi32>
    %38 = arith.cmpi slt, %36, %37 : vector<16x1xi32>
    %c0_i32_13 = arith.constant 0 : i32
    %39 = vector.broadcast %c0_i32_13 : i32 to vector<16x1xi32>
    %40 = arith.cmpi ne, %4, %39 : vector<16x1xi32>
    %41 = arith.andi %38, %40 : vector<16x1xi1>
    %cst_14 = arith.constant 0.000000e+00 : f32
    %42 = vector.broadcast %cst_14 : f32 to vector<16x1xf32>
    %43 = arith.select %41, %32, %42 : vector<16x1xi1>, vector<16x1xf32>
    %44 = vector.shape_cast %43 : vector<16x1xf32> to vector<1x16x1xf32>
    %cst_15 = arith.constant dense<0.000000e+00> : vector<1xf32>
    %45 = vector.multi_reduction <add>, %44, %cst_15 [1, 2] : vector<1x16x1xf32> to vector<1xf32>
    %46 = vector.shape_cast %45 : vector<1xf32> to vector<1x1x1xf32>
    %47 = vector.extract %46[0, 0, 0] : f32 from vector<1x1x1xf32>
    %c0_16 = arith.constant 0 : index
    %c0_17 = arith.constant 0 : index
    %48 = memref.load %arg4[%c0_16, %c0_17] : memref<1x1xf32, #tpu.memory_space<smem>>
    %49 = arith.addf %48, %47 : f32
    %c0_18 = arith.constant 0 : index
    %c0_19 = arith.constant 0 : index
    %50 = memref.load %arg4[%c0_18, %c0_19] : memref<1x1xf32, #tpu.memory_space<smem>>
    memref.store %49, %arg4[%c0_18, %c0_19] : memref<1x1xf32, #tpu.memory_space<smem>>
    %c0_i32_20 = arith.constant 0 : i32
    %51 = arith.cmpi eq, %arg0, %c0_i32_20 : i32
    %52 = arith.extui %51 : i1 to i32
    %c0_i32_21 = arith.constant 0 : i32
    %53 = arith.cmpi ne, %52, %c0_i32_21 : i32
    scf.if %53 {
      %c0_22 = arith.constant 0 : index
      %c0_23 = arith.constant 0 : index
      %54 = memref.load %arg4[%c0_22, %c0_23] : memref<1x1xf32, #tpu.memory_space<smem>>
      %c0_24 = arith.constant 0 : index
      %c0_25 = arith.constant 0 : index
      %55 = memref.load %arg3[%c0_24, %c0_25] : memref<1x1xf32, #tpu.memory_space<smem>>
      memref.store %54, %arg3[%c0_24, %c0_25] : memref<1x1xf32, #tpu.memory_space<smem>>
    } else {
    }
    return
  }
  func.func @transform_0(%arg0: i32) -> (i32, i32) {
    %c0_i32 = arith.constant 0 : i32
    %c0_i32_0 = arith.constant 0 : i32
    return %arg0, %c0_i32 : i32, i32
  }
  func.func @transform_1(%arg0: i32) -> (i32, i32) {
    %c0_i32 = arith.constant 0 : i32
    %c0_i32_0 = arith.constant 0 : i32
    return %arg0, %c0_i32 : i32, i32
  }
  func.func @transform_2(%arg0: i32) -> (i32, i32) {
    %c0_i32 = arith.constant 0 : i32
    %c0_i32_0 = arith.constant 0 : i32
    %c0_i32_1 = arith.constant 0 : i32
    return %c0_i32, %c0_i32_0 : i32, i32
  }
}

</mosaic_0001>

<bundles_post_ra>
// kernel: tpu_custom_call.1
= control target key start
LH: loop header
LB: loop body
LE: loop exit
PB: predicated region body
PF: predicated region fallthrough
CT: control target
= control target key end

     0   :  { %vm22_vm0 = vcmask 261120   ;;  %v160_v4 = vmov 0   ;;  %s217_s0 = inlined_call_operand.vmem [shape: f32[16,32], index: 0, kind: input, shape index: {}]   ;;  %s218_s1 = inlined_call_operand.vmem [shape: s32[16,1], index: 1, kind: input, shape index: {}]   ;;  %s219_s2 = inlined_call_operand.hbm [shape: f32[1,1], index: 2, kind: output, shape index: {}]  }
   0x1   :  { %v18_v0 = vld [vmem:[%s217_s0] sm:$0xff]  ;;  %v19_v1 = vld [vmem:[%s217_s0 + $0x8] sm:$0xff]  ;;  %138 = vset.pattern.permute.xlu1 %v160_v4  ;;  %139 = vset.pattern.permute.xlu0 %v160_v4 }
   0x2   :  { %v186_v2 = vld [vmem:[%s218_s1] sm:$0xff]  ;;  %v23_v3 = vsel %vm22_vm0, %v18_v0, -inf }
   0x3   :  { %7 = vsyncpa [#allocation4], 0  ;;  %24 = vmax.xlane.f32.xlu0 %v23_v3  ;;  %54 = vperm.xlu1 %138, %v186_v2   ;;  %v26_v5 = vsel %vm22_vm0, %v19_v1, -inf  ;;  %v194_v6 = vld [vmem:[%s218_s1 + $0x8] sm:$0xff]  ;;  %v51_v12 = vlaneseq  ;;  %vm92_vm3 = vcmp.ne.s32.totalorder %v186_v2, 0  ;;  %vm98_vm5 = vcmask 7168  }
   0x4   :  { %vm93_vm4 = vcmp.ne.s32.totalorder %v194_v6, 0  ;;  %s148_s18 = scalar_lea.hbm %s219_s2, 16 }
   0x5   :  { %v52_v15 = vand.u32 127, %v51_v12  ;;  %p149_p0 = scmp.ne.s32.totalorder %s219_s2, %s148_s18  ;;  %p152_p1 = scmp.lt.u32.totalorder %s148_s18, %s219_s2 }
   0x7   :  { %27 = vmax.xlane.f32.xlu0 %v26_v5  ;;  %57 = vperm.xlu1 %138, %v194_v6   ;;  %p154_p2 = pnand %p152_p1, %p149_p0 }
  0x82   :  { %v55_v14 = vpop.permute.xlu1 %54 }
  0x83   :  { %vm59_vm1 = vcmp.eq.s32.totalorder %v52_v15, %v55_v14 }
  0x86   :  { %v58_v17 = vpop.permute.xlu1 %57 }
  0x87   :  { %vm60_vm2 = vcmp.eq.s32.totalorder %v52_v15, %v58_v17 }
  0x90   :  { %v25_v7 = vpop.xlane.xlu0 %24 }
  0x91   :  { %v29_v8 = vsub.f32 %v18_v0, %v25_v7 }
  0x93   :  { %v31_v9 = vmul.f32 1.442695, %v29_v8  ;;  %v61_v19 = vsel %vm59_vm1, %v29_v8, 0.0  ;;  %v45_v25 = vsel %vm22_vm0, %v29_v8, 0.0 }
  0x94   :  { %v28_v10 = vpop.xlane.xlu0 %27  ;;  %v63_v21 = vsel %vm22_vm0, %v61_v19, 0.0 }
  0x95   :  { %140 = vpow2.f32 %v31_v9  ;;  %v30_v11 = vsub.f32 %v19_v1, %v28_v10 }
  0x97   :  { %v33_v13 = vmul.f32 1.442695, %v30_v11  ;;  %v62_v23 = vsel %vm60_vm2, %v30_v11, 0.0  ;;  %v48_v26 = vsel %vm22_vm0, %v30_v11, 0.0 }
  0x98   :  { %v66_v24 = vsel %vm22_vm0, %v62_v23, 0.0 }
  0x99   :  { %142 = vpow2.f32 %v33_v13 }
  0x9f   :  { %v141_v16 = vpop.eup %140 }
  0xa0   :  { %v35_v18 = vsel %vm22_vm0, %v141_v16, 0.0 }
  0xa1   :  { %36 = vadd.xlane.f32.xlu0 %v35_v18 }
  0xa3   :  { %v143_v20 = vpop.eup %142 }
  0xa4   :  { %v38_v22 = vsel %vm22_vm0, %v143_v20, 0.0 }
  0xa5   :  { %64 = vadd.xlane.f32.xlu0 %v63_v21  ;;  %39 = vadd.xlane.f32.xlu1 %v38_v22 }
  0xa9   :  { %67 = vadd.xlane.f32.xlu0 %v66_v24 }
  0xad   :  { %46 = vadd.xlane.f32.xlu0 %v45_v25 }
  0xb1   :  { %49 = vadd.xlane.f32.xlu0 %v48_v26 }
 0x12e   :  { %v37_v27 = vpop.xlane.xlu0 %36 }
 0x12f   :  { %144 = vlog2.f32 %v37_v27 }
 0x132   :  { %v40_v28 = vpop.xlane.xlu1 %39  ;;  %v65_v29 = vpop.xlane.xlu0 %64 }
 0x133   :  { %146 = vlog2.f32 %v40_v28 }
 0x136   :  { %v68_v30 = vpop.xlane.xlu0 %67 }
 0x139   :  { %v145_v31 = vpop.eup %144 }
 0x13a   :  { %v42_v32 = vmul.f32 0.6931472, %v145_v31  ;;  %v47_v33 = vpop.xlane.xlu0 %46 }
 0x13c   :  { %v69_v34 = vsub.f32 %v65_v29, %v42_v32  ;;  %v71_v35 = vmul.f32 32.0, %v42_v32 }
 0x13d   :  { %v147_v36 = vpop.eup %146 }
 0x13e   :  { %v75_v37 = vmul.f32 0.89666665, %v69_v34  ;;  %v44_v38 = vmul.f32 0.6931472, %v147_v36  ;;  %v73_v39 = vsub.f32 %v47_v33, %v71_v35  ;;  %v50_v44 = vpop.xlane.xlu0 %49 }
 0x140   :  { %v77_v40 = vsub.f32 -0.6842153, %v75_v37  ;;  %v70_v41 = vsub.f32 %v68_v30, %v44_v38  ;;  %v79_v42 = vmul.f32 0.0033333334, %v73_v39  ;;  %v72_v43 = vmul.f32 32.0, %v44_v38 }
 0x142   :  { %v76_v45 = vmul.f32 0.89666665, %v70_v41  ;;  %v81_v46 = vsub.f32 %v77_v40, %v79_v42  ;;  %v74_v47 = vsub.f32 %v50_v44, %v72_v43 }
 0x144   :  { %v78_v48 = vsub.f32 -0.6842153, %v76_v45  ;;  %v80_v49 = vmul.f32 0.0033333334, %v74_v47  ;;  %v96_v51 = vsel %vm92_vm3, %v81_v46, 0.0 }
 0x145   :  { %v99_v53 = vsel %vm98_vm5, %v96_v51, 0.0 }
 0x146   :  { %v82_v50 = vsub.f32 %v78_v48, %v80_v49 }
 0x148   :  { %v97_v52 = vsel %vm93_vm4, %v82_v50, 0.0 }
 0x149   :  { %v100_v54 = vsel %vm98_vm5, %v97_v52, 0.0 }
 0x14a   :  { %v101_v55 = vadd.f32 %v100_v54, %v99_v53 }
 0x14c   :  { %102 = vadd.xlane.f32.xlu0 %v101_v55 }
 0x1d9   :  { %v103_v56 = vpop.xlane.xlu0 %102 }
 0x1da   :  { %v104_v57 = vrot.slane %v103_v56, 4 }
 0x1dc   :  { %v105_v58 = vadd.f32 %v104_v57, %v103_v56 }
 0x1de   :  { %v106_v59 = vrot.slane %v105_v58, 2 }
 0x1e0   :  { %v107_v60 = vadd.f32 %v106_v59, %v105_v58 }
 0x1e2   :  { %v108_v61 = vrot.slane %v107_v60, 1 }
 0x1e4   :  { %v109_v62 = vadd.f32 %v108_v61, %v107_v60 }
 0x1e6   :  { %134 = vpush %v109_v62 }
 0x217   :  { %s135_s0 = spop %134 }
 0x218   :  { %120 = sst [smem:[#allocation3]] %s135_s0 }
 0x219   :  { %157 = shalt.err (!%p154_p2)
}
 0x21a   :  { %s161_s23 = smov [#allocation3]  }
 0x21b   :  { %128 = dma.smem_to_hbm %s161_s23, 16, %s219_s2, [#allocation4]  }
 0x21c   :  { %158 = dma.done.wait [#allocation4], 16  }
 0x21d   :  { %159 = vsyncadd [#allocation4], 4294967280 }
 0x21e   :  { %132 = sfence }
 0x21f   :  { %133 = vsyncpa [#allocation4], 1 }

</bundles_post_ra>
